<compile_context>
chip_gen: v7x
topology: tpu7x:2x2x1
jax: 0.10.0
libtpu: 0.0.40
codegen_flags: <defaults>
</compile_context>

<pallas_src>
import functools

import jax
import jax.numpy as jnp
from jax import lax
from jax.experimental import pallas as pl
from jax.experimental.pallas import tpu as pltpu


def _word_dropout_kernel(seed_ref, x_ref, o_ref, *, thresh24, unk_idx,
                         padding_idx, block_rows, seq_len):
    x = x_ref[...]
    shape = x_ref.shape  # (block_rows, seq_len)

    # Global element index for every token in this block.
    row = lax.broadcasted_iota(jnp.int32, shape, 0) + pl.program_id(0) * block_rows
    col = lax.broadcasted_iota(jnp.int32, shape, 1)
    idx = row * seq_len + col

    # Stateless counter-based hash (murmur3 fmix32 finalizer) of (seed, idx).
    # Pure VPU integer ops -> lowers on Mosaic and in interpret mode alike, and
    # is a pure function of (seed, element index): safe under tiling / megacore.
    h = idx.astype(jnp.uint32) * jnp.uint32(0x9E3779B1) + seed_ref[0].astype(jnp.uint32)
    h = h ^ (h >> jnp.uint32(16))
    h = h * jnp.uint32(0x85EBCA6B)
    h = h ^ (h >> jnp.uint32(13))
    h = h * jnp.uint32(0xC2B2AE35)
    h = h ^ (h >> jnp.uint32(16))

    # Top 24 bits as a non-negative int32 -> compare against integer threshold
    # (no u32->f32 convert, no shift-to-float, no multiply).
    r24 = (h >> jnp.uint32(8)).astype(jnp.int32)
    p_mask = r24 < jnp.int32(thresh24)

    unk_mask = jnp.logical_and(x != jnp.int32(padding_idx), p_mask)
    o_ref[...] = jnp.where(unk_mask, jnp.int32(unk_idx), x)


def word_dropout(x, seed, *, p, unk_idx, padding_idx=0, training=True,
                 block_rows=None):
    """Pallas TPU implementation of WordDropout.forward.

    x:    int32 token ids, shape (B, S)
    seed: python int / int32 scalar used to derive per-token random bits
    """
    if p < 0 or p > 1:
        raise ValueError("p should be a probability, 0 <= p <= 1.")
    if p == 0 or not training:
        return x

    B, S = x.shape

    if block_rows is None:
        # ~2 MiB int32 blocks: 2 input bufs + 2 output bufs ~= 8 MiB total,
        # safe even under v5e's 16 MiB scoped-VMEM default.
        target_rows = (2 * 1024 * 1024) // max(S * 4, 1)
        block_rows = max(8, (target_rows // 8) * 8)
    block_rows = min(block_rows, B)

    grid = (pl.cdiv(B, block_rows),)

    # p quantized to 24 bits (same resolution as the previous float path).
    thresh24 = min(int(round(float(p) * (1 << 24))), 1 << 24)

    kernel = functools.partial(
        _word_dropout_kernel, thresh24=thresh24, unk_idx=int(unk_idx),
        padding_idx=int(padding_idx), block_rows=int(block_rows), seq_len=int(S))

    seed_arr = jnp.asarray([seed], dtype=jnp.int32)

    return pl.pallas_call(
        kernel,
        out_shape=jax.ShapeDtypeStruct(x.shape, x.dtype),
        grid=grid,
        in_specs=[
            pl.BlockSpec(memory_space=pltpu.MemorySpace.SMEM),       # seed scalar
            pl.BlockSpec((block_rows, S), lambda i: (i, 0)),         # token ids
        ],
        out_specs=pl.BlockSpec((block_rows, S), lambda i: (i, 0)),
        compiler_params=pltpu.CompilerParams(
            dimension_semantics=("parallel",)),
        cost_estimate=pl.CostEstimate(
            flops=12 * x.size, transcendentals=0,
            bytes_accessed=2 * x.size * 4),
    )(seed_arr, x)


if __name__ == "__main__":
    key = jax.random.PRNGKey(0)
    B, S = 32, 256          # small demo shape; block_rows=8 -> grid of 4 tiles
    VOCAB = 100
    UNK_IDX = 1
    PAD_IDX = 0
    P = 0.3

    # Deterministic example ids; force some padding tokens at the tail.
    ids = jax.random.randint(key, (B, S), minval=2, maxval=VOCAB, dtype=jnp.int32)
    pad_tail = jnp.arange(S)[None, :] >= (S - 32)   # last 32 positions are padding
    x = jnp.where(pad_tail, PAD_IDX, ids).astype(jnp.int32)

    out = word_dropout(x, seed=1234, p=P, unk_idx=UNK_IDX, padding_idx=PAD_IDX,
                       training=True, block_rows=8)
    out = jax.block_until_ready(out)

    # Sanity checks on semantics (not a bitwise ref, dropout is stochastic):
    #  - padding positions are untouched
    #  - every changed position is now UNK
    #  - unchanged positions equal the input
    #  - drop fraction on non-padding tokens is roughly p
    assert bool(jnp.all(jnp.where(x == PAD_IDX, out == PAD_IDX, True)))
    changed = out != x
    assert bool(jnp.all(jnp.where(changed, out == UNK_IDX, True)))
    assert bool(jnp.all(jnp.where(~changed, out == x, True)))
    non_pad = x != PAD_IDX
    drop_frac = float(jnp.sum(changed & non_pad) / jnp.sum(non_pad))
    assert 0.2 < drop_frac < 0.4, f"unexpected drop fraction {drop_frac}"

    print("KERNEL_OK")
</pallas_src>

<mosaic_0001>
module attributes {stable_mosaic.version = 11 : i64} {
  func.func @_word_dropout_kernel(%arg0: i32, %arg1: memref<1xi32, #tpu.memory_space<smem>>, %arg2: memref<8x256xi32, #tpu.memory_space<vmem>>, %arg3: memref<8x256xi32, #tpu.memory_space<vmem>>) attributes {dimension_semantics = [#tpu.dimension_semantics<parallel>], iteration_bounds = array<i64: 4>, scalar_prefetch = 0 : i64, scratch_operands = 0 : i64, tpu.core_type = #tpu.core_type<tc>, window_params = [{transform_indices = @transform_0, window_bounds = array<i64: 1>}, {transform_indices = @transform_1, window_bounds = array<i64: 8, 256>}, {transform_indices = @transform_2, window_bounds = array<i64: 8, 256>}]} {
    %c0 = arith.constant 0 : index
    %c0_0 = arith.constant 0 : index
    %0 = vector.load %arg2[%c0, %c0_0] : memref<8x256xi32, #tpu.memory_space<vmem>>, vector<8x256xi32>
    %1 = tpu.iota {dimensions = array<i32: 0>} : vector<8x256xi32>
    %c8_i32 = arith.constant 8 : i32
    %2 = arith.muli %arg0, %c8_i32 : i32
    %3 = vector.broadcast %2 : i32 to vector<8x256xi32>
    %4 = arith.addi %1, %3 : vector<8x256xi32>
    %5 = tpu.iota {dimensions = array<i32: 1>} : vector<8x256xi32>
    %c256_i32 = arith.constant 256 : i32
    %6 = vector.broadcast %c256_i32 : i32 to vector<8x256xi32>
    %7 = arith.muli %4, %6 : vector<8x256xi32>
    %8 = arith.addi %7, %5 : vector<8x256xi32>
    %c-1640531535_i32 = arith.constant -1640531535 : i32
    %9 = vector.broadcast %c-1640531535_i32 : i32 to vector<8x256xi32>
    %10 = arith.muli %8, %9 : vector<8x256xi32>
    %c0_1 = arith.constant 0 : index
    %11 = memref.load %arg1[%c0_1] : memref<1xi32, #tpu.memory_space<smem>>
    %12 = vector.broadcast %11 : i32 to vector<8x256xi32>
    %13 = arith.addi %10, %12 : vector<8x256xi32>
    %c16_i32 = arith.constant 16 : i32
    %14 = vector.broadcast %c16_i32 : i32 to vector<8x256xi32>
    %15 = arith.shrui %13, %14 : vector<8x256xi32>
    %16 = arith.xori %13, %15 : vector<8x256xi32>
    %c-2048144789_i32 = arith.constant -2048144789 : i32
    %17 = vector.broadcast %c-2048144789_i32 : i32 to vector<8x256xi32>
    %18 = arith.muli %16, %17 : vector<8x256xi32>
    %c13_i32 = arith.constant 13 : i32
    %19 = vector.broadcast %c13_i32 : i32 to vector<8x256xi32>
    %20 = arith.shrui %18, %19 : vector<8x256xi32>
    %21 = arith.xori %18, %20 : vector<8x256xi32>
    %c-1028477387_i32 = arith.constant -1028477387 : i32
    %22 = vector.broadcast %c-1028477387_i32 : i32 to vector<8x256xi32>
    %23 = arith.muli %21, %22 : vector<8x256xi32>
    %c16_i32_2 = arith.constant 16 : i32
    %24 = vector.broadcast %c16_i32_2 : i32 to vector<8x256xi32>
    %25 = arith.shrui %23, %24 : vector<8x256xi32>
    %26 = arith.xori %23, %25 : vector<8x256xi32>
    %c8_i32_3 = arith.constant 8 : i32
    %27 = vector.broadcast %c8_i32_3 : i32 to vector<8x256xi32>
    %28 = arith.shrui %26, %27 : vector<8x256xi32>
    %c5033165_i32 = arith.constant 5033165 : i32
    %29 = vector.broadcast %c5033165_i32 : i32 to vector<8x256xi32>
    %30 = arith.cmpi slt, %28, %29 : vector<8x256xi32>
    %c0_i32 = arith.constant 0 : i32
    %31 = vector.broadcast %c0_i32 : i32 to vector<8x256xi32>
    %32 = arith.cmpi ne, %0, %31 : vector<8x256xi32>
    %33 = arith.andi %32, %30 : vector<8x256xi1>
    %c1_i32 = arith.constant 1 : i32
    %34 = vector.broadcast %c1_i32 : i32 to vector<8x256xi32>
    %35 = arith.select %33, %34, %0 : vector<8x256xi1>, vector<8x256xi32>
    %c0_4 = arith.constant 0 : index
    %c0_5 = arith.constant 0 : index
    %36 = vector.load %arg3[%c0_4, %c0_5] : memref<8x256xi32, #tpu.memory_space<vmem>>, vector<8x256xi32>
    tpu.vector_store %arg3[%c0_4, %c0_5], %35 {strides = array<i32>} : memref<8x256xi32, #tpu.memory_space<vmem>>, vector<8x256xi32>,
    return
  }
  func.func @transform_0(%arg0: i32) -> i32 {
    %c0_i32 = arith.constant 0 : i32
    %c0_i32_0 = arith.constant 0 : i32
    return %c0_i32 : i32
  }
  func.func @transform_1(%arg0: i32) -> (i32, i32) {
    %c0_i32 = arith.constant 0 : i32
    %c0_i32_0 = arith.constant 0 : i32
    return %arg0, %c0_i32 : i32, i32
  }
  func.func @transform_2(%arg0: i32) -> (i32, i32) {
    %c0_i32 = arith.constant 0 : i32
    %c0_i32_0 = arith.constant 0 : i32
    return %arg0, %c0_i32 : i32, i32
  }
}

</mosaic_0001>

<bundles_post_ra>
// kernel: tpu_custom_call.1
= control target key start
LH: loop header
LB: loop body
LE: loop exit
PB: predicated region body
PF: predicated region fallthrough
CT: control target
= control target key end

     0   :  { %s642_s0 = inlined_call_operand.<no memory space> [shape: s32[1], index: 0, kind: input, shape index: {}]   ;;  %s643_s1 = inlined_call_operand.hbm [shape: s32[32,256], index: 1, kind: input, shape index: {}]   ;;  %s644_s2 = inlined_call_operand.hbm [shape: s32[32,256], index: 2, kind: output, shape index: {}]  }
   0x1   :  { %7 = sst [smem:[#allocation2]] %s642_s0 }
   0x2   :  { %8 = vsyncpa [#allocation4], 0 }
   0x3   :  { %10 = vsyncpa [#allocation4 + $0x1], 0 }
   0x4   :  { %11 = vsyncpa [#allocation5], 0 }
   0x5   :  { %13 = vsyncpa [#allocation5 + $0x1], 0  ;;  %s474_s11 = smov 0   ;;  %s476_s12 = smov 0  }
   0x6   :  { %s478_s13 = smov 0   ;;  %s480_s14 = smov 0  }
   0x7 LB: > { %s495_s0 = sadd.s32 4294967295, %s452_s14   ;;  %s293_s15 = sadd.s32 4294967294, %s452_s14   ;;  %s452_s14 = sphi %s480_s14, %s658_s14   ;;  %s448_s13 = sphi %s478_s13, %s657_s13   ;;  %s444_s12 = sphi %s476_s12, %s656_s12   ;;  %s440_s11 = sphi %s474_s11, %s655_s11  }
   0x8   : > { %s499_s16 = sadd.s32 1, %s452_s14   ;;  %s47_s17 = sadd.s32 1, %s448_s13 }
   0x9   : > { %s44_s18 = ssub.s32 %s452_s14, %s499_s16  ;;  %p54_p0 = scmp.ne.s32.totalorder %s448_s13, %s444_s12 }
   0xa   : > { %p45_p1 = scmp.eq.s32.totalorder %s44_s18, 0  ;;  %p55_p2 = scmp.eq.s32.totalorder %s452_s14, 0 }
   0xb   : > { %p60_p3 = scmp.ne.s32.totalorder %s444_s12, %s440_s11  ;;  %p61_p4 = scmp.eq.s32.totalorder %s495_s0, 0 }
   0xc   : > { %s511_s19 = scalar_select %p45_p1, %s448_s13, %s47_s17  }
   0xd   : > { %p513_p5 = por %p55_p2, %p54_p0  ;;  %p517_p6 = por %p61_p4, %p60_p3 }
   0xe   : > { %p84_p7 = scmp.eq.s32.totalorder %s495_s0, 3  ;;  %p90_p8 = scmp.eq.s32.totalorder %s293_s15, 3 }
   0xf   : > { %p322_p9 = scmp.lt.s32.totalorder %s452_s14, 4  ;;  %s113_s24 = sand.u32 1, %s448_s13  }
  0x10   : > { %p523_p10 = por %p84_p7, %p54_p0  ;;  %p527_p11 = por %p90_p8, %p60_p3 }
  0x11   : > { %s308_s25 = sshll.u32 %s452_s14, 8  ;;  %s296_s26 = sshll.u32 %s113_s24, 4 }
  0x12   : > { %s648_s22 = scalar_select %p523_p10, 1, 0 }
  0x13   : > { %s649_s23 = scalar_select %p527_p11, 1, 0 }
  0x14   : > { %s536_s29 = scalar_lea.hbm %s643_s1, %s308_s25  ;;  %s117_s30 = scalar_lea.vmem [#allocation3], %s296_s26 }
  0x15   : > { %s125_s3 = sshll.u32 %s117_s30, 4  ;;  %p540_p12 = pnand %p322_p9, %p513_p5  ;;  %s544_s3 = int_to_ptr.vmem [resolvable:$true] %s125_s3 }
  0x16   : > { %s114_s5 = scalar_lea.sflag [#allocation4], %s113_s24  ;;  %s356_s6 = scalar_lea.hbm %s536_s29, 256 }
  0x17   : > { %p357_p1 = scmp.ne.s32.totalorder %s536_s29, %s356_s6  ;;  %p358_p2 = pneg %p540_p12 }
  0x18   : > { %s361_s9 = scalar_lea.hbm %s643_s1, 1024  ;;  %p362_p5 = scmp.lt.u32.totalorder %s536_s29, %s643_s1 }
  0x19   : > { %p359_p3 = pnand %p358_p2, %p357_p1  ;;  %p363_p7 = scmp.lt.u32.totalorder %s361_s9, %s356_s6 }
  0x1a   : > { %p365_p9 = scmp.lt.u32.totalorder %s356_s6, %s536_s29 }
  0x1b   : > { %p360_p4 = pneg %p359_p3  ;;  %p364_p8 = por %p363_p7, %p362_p5 }
  0x1d   : > { %p366_p13 = por %p365_p9, %p364_p8 }
  0x1f   : > { %p367_p0 = pnand %p366_p13, %p360_p4 }
  0x21   : > { %370 = shalt.err (!%p367_p0)
}
  0x22   : > { %s371_s17 = scalar_lea.vmem %s544_s3, 256  ;;  %s454_s18 = smov [#allocation3]  }
  0x23   : > { %p372_p1 = scmp.ne.s32.totalorder %s544_s3, %s371_s17  ;;  %s376_s20 = sshll.u32 %s454_s18, 4  ;;  %s377_s20 = int_to_ptr.vmem [resolvable:$false] %s376_s20 }
  0x24   : > { %s378_s24 = scalar_lea.vmem %s377_s20, 512  ;;  %p379_p10 = scmp.lt.s32.totalorder %s544_s3, %s377_s20 }
  0x25   : > { %p374_p3 = pnand %p372_p1, %p358_p2  ;;  %p380_p5 = scmp.lt.s32.totalorder %s378_s24, %s371_s17 }
  0x27   : > { %p375_p11 = pneg %p374_p3  ;;  %p381_p7 = por %p380_p5, %p379_p10 }
  0x29   : > { %p382_p8 = pnand %p381_p7, %p375_p11 }
  0x2b   : > { %385 = shalt.err (!%p382_p8)
}
  0x2c   : > { %317 = dma.hbm_to_vmem [thread:$0]  (!%p540_p12), %s536_s29, 256, %s544_s3, %s114_s5  }
  0x2d   : > { %p651_p13 = scmp.lt.s32.totalorder %s452_s14, 5  ;;  %p652_p0 = scmp.ge.s32.totalorder %s452_s14, 1 }
  0x2f   : > { %p131_p2 = pnand %p652_p0, %p651_p13 }
  0x30   : > { %s578_s25 = sand.u32 (!%p131_p2), 1, %s444_s12  }
  0x31   : > { %134 = sbr.rel (%p131_p2) target bundleno = 107 (0x6b), region = 28  ;;  %s300_s26 = sshll.u32 (!%p131_p2), %s578_s25, 4 }
  0x32   : > { %s137_s27 = scalar_lea.sflag (!%p131_p2), [#allocation4], %s578_s25  ;;  %s584_s28 = scalar_lea.vmem (!%p131_p2), [#allocation3], %s300_s26 }
  0x38   : > { %431 = dma.done.wait (%p517_p6), %s137_s27, 256  }
  0x39   : > { %433 = vsyncadd (%p517_p6), %s137_s27, 4294967040  ;;  %v163_v0 = vlaneseq  ;;  %s302_s29 = sshll.u32 %s495_s0, 3  ;;  %s176_s30 = sld [smem:[#allocation2]]  ;;  %v161_v28 = vld [vmem:[%s584_s28] sm:$0xff]  ;;  %v162_v30 = vld [vmem:[%s584_s28 + $0x8] sm:$0xff] }
  0x3a   : > { %v166_v1 = vstv %s302_s29  ;;  %vm200_vm0 = vcmp.ne.s32.totalorder %v161_v28, 0  ;;  %s160_s21 = scalar_lea.vmem [#allocation6], %s300_s26  ;;  %vm201_vm1 = vcmp.ne.s32.totalorder %v162_v30, 0  ;;  %s309_s4 = sshll.u32 %s495_s0, 8 }
  0x3b   : > { %v164_v2 = vshrl.u32 %v163_v0, 7  ;;  %v169_v3 = vand.u32 127, %v163_v0  ;;  %s223_s3 = sshll.u32 %s160_s21, 4  ;;  %s601_s7 = scalar_lea.hbm %s644_s2, %s309_s4  ;;  %s596_s3 = int_to_ptr.vmem [resolvable:$true] %s223_s3 }
  0x3c   : > { %s209_s8 = scalar_lea.sflag [#allocation5], %s578_s25  ;;  %s386_s0 = scalar_lea.vmem %s596_s3, 256 }
  0x3d   : > { %v167_v4 = vadd.s32 %v166_v1, %v164_v2  ;;  %v170_v5 = vadd.s32 128, %v169_v3  ;;  %p387_p6 = scmp.ne.s32.totalorder %s596_s3, %s386_s0  ;;  %p653_p10 = scmp.ne.s32.totalorder %s648_s22, 0 }
  0x3e   : > { %s455_s9 = smov [#allocation6]  }
  0x3f   : > { %v171_v6 = vmul.u32 256, %v167_v4  ;;  %v177_v9 = vstv %s176_s30  ;;  %p388_p11 = pnand %p387_p6, %p653_p10  ;;  %s390_s10 = sshll.u32 %s455_s9, 4  ;;  %s391_s10 = int_to_ptr.vmem [resolvable:$false] %s390_s10 }
  0x40   : > { %s392_s15 = scalar_lea.vmem %s391_s10, 512  ;;  %p393_p4 = scmp.lt.s32.totalorder %s596_s3, %s391_s10 }
  0x41   : > { %v172_v7 = vadd.s32 %v171_v6, %v169_v3  ;;  %v173_v8 = vadd.s32 %v171_v6, %v170_v5  ;;  %p389_p12 = pneg %p388_p11  ;;  %p394_p9 = scmp.lt.s32.totalorder %s392_s15, %s386_s0 }
  0x43   : > { %v174_v10 = vmul.u32 2654435761, %v172_v7  ;;  %v175_v11 = vmul.u32 2654435761, %v173_v8  ;;  %p395_p1 = por %p394_p9, %p393_p4 }
  0x45   : > { %v178_v12 = vadd.s32 %v177_v9, %v174_v10  ;;  %v179_v13 = vadd.s32 %v177_v9, %v175_v11  ;;  %p396_p3 = pnand %p395_p1, %p389_p12 }
  0x47   : > { %v180_v14 = vshrl.u32 %v178_v12, 16  ;;  %v181_v15 = vshrl.u32 %v179_v13, 16 }
  0x49   : > { %v182_v16 = vxor.u32 %v180_v14, %v178_v12  ;;  %v183_v17 = vxor.u32 %v181_v15, %v179_v13 }
  0x4b   : > { %v184_v18 = vmul.u32 2246822507, %v182_v16  ;;  %v185_v19 = vmul.u32 2246822507, %v183_v17 }
  0x4d   : > { %v186_v20 = vshrl.u32 %v184_v18, 13  ;;  %v187_v21 = vshrl.u32 %v185_v19, 13 }
  0x4f   : > { %v188_v22 = vxor.u32 %v186_v20, %v184_v18  ;;  %v189_v23 = vxor.u32 %v187_v21, %v185_v19 }
  0x51   : > { %v190_v24 = vmul.u32 3266489909, %v188_v22  ;;  %v191_v25 = vmul.u32 3266489909, %v189_v23 }
  0x53   : > { %v192_v26 = vshrl.u32 %v190_v24, 16  ;;  %v193_v27 = vshrl.u32 %v191_v25, 16 }
  0x55   : > { %v194_v29 = vxor.u32 %v192_v26, %v190_v24  ;;  %v195_v31 = vxor.u32 %v193_v27, %v191_v25 }
  0x57   : > { %v196_v32 = vshrl.u32 %v194_v29, 8  ;;  %v197_v33 = vshrl.u32 %v195_v31, 8 }
  0x59   : > { %vm198_vm2 = vcmp.lt.s32.totalorder %v196_v32, 5033165  ;;  %vm199_vm3 = vcmp.lt.s32.totalorder %v197_v33, 5033165 }
  0x5a   : > { %vm202_vm4 = vmand %vm200_vm0, %vm198_vm2 }
  0x5b   : > { %v204_v34 = vsel %vm202_vm4, 1, %v161_v28  ;;  %vm203_vm5 = vmand %vm201_vm1, %vm199_vm3 }
  0x5c   : > { %206 = vst [vmem:[%s160_s21] sm:$0xff] %v204_v34  ;;  %v205_v35 = vsel %vm203_vm5, 1, %v162_v30 }
  0x5d   : > { %207 = vst [vmem:[%s160_s21 + $0x8] sm:$0xff] %v205_v35 }
  0x5e   : > { %399 = shalt.err (!%p396_p3)
}
  0x5f   : > { %s400_s17 = scalar_lea.hbm %s601_s7, 256  ;;  %s404_s24 = scalar_lea.hbm %s644_s2, 1024 }
  0x60   : > { %p401_p5 = scmp.ne.s32.totalorder %s601_s7, %s400_s17  ;;  %p405_p13 = scmp.lt.u32.totalorder %s601_s7, %s644_s2 }
  0x61   : > { %p406_p0 = scmp.lt.u32.totalorder %s404_s24, %s400_s17  ;;  %p408_p6 = scmp.lt.u32.totalorder %s400_s17, %s601_s7 }
  0x62   : > { %p402_p7 = pnand %p401_p5, %p653_p10 }
  0x63   : > { %p407_p2 = por %p406_p0, %p405_p13 }
  0x64   : > { %p403_p8 = pneg %p402_p7 }
  0x65   : > { %p409_p11 = por %p408_p6, %p407_p2 }
  0x67   : > { %p410_p12 = pnand %p409_p11, %p403_p8 }
  0x69   : > { %413 = shalt.err (!%p410_p12)
}
  0x6a   : > { %312 = dma.vmem_to_hbm [thread:$0]  (%p653_p10), %s596_s3, 256, %s601_s7, %s209_s8  }
  0x6b PF: > { %p323_p4 = scmp.ge.s32.totalorder %s452_s14, 2  ;;  %s235_s27 = sand.u32 1, %s440_s11  }
  0x6c   : > { %p654_p9 = scmp.ne.s32.totalorder %s649_s23, 0  ;;  %s236_s28 = scalar_lea.sflag [#allocation5], %s235_s27 }
  0x6e   : > { %p319_p1 = pnand %p323_p4, %p654_p9 }
  0x70   : > { %435 = dma.done.wait (!%p319_p1), %s236_s28, 256  }
  0x71   : > { %437 = vsyncadd (!%p319_p1), %s236_s28, 4294967040  ;;  %p16_p3 = scmp.ge.s32.totalorder %s499_s16, 6   ;;  %s655_s11 = smov %s444_s12 }
  0x72   : > { %s656_s12 = smov %s448_s13  ;;  %s657_s13 = smov %s511_s19 }
  0x73   : > { %s658_s14 = smov %s499_s16  ;;  %18 = sbr.rel (!%p16_p3) target bundleno = 7 (0x7), region = 73 }
  0x7a   :  { %241 = vsyncpa [#allocation4], 1 }
  0x7b   :  { %243 = vsyncpa [#allocation4 + $0x1], 1 }
  0x7c   :  { %244 = vsyncpa [#allocation5], 1 }
  0x7d   :  { %246 = vsyncpa [#allocation5 + $0x1], 1 }

</bundles_post_ra>
